<compile_context>
chip_gen: v6e
topology: v6e:2x2x1
jax: 0.10.0
libtpu: 0.0.40
codegen_flags: <defaults>
</compile_context>

<pallas_src>
from functools import partial

import numpy as np
import jax
import jax.numpy as jnp
from jax.experimental import pallas as pl
from jax.experimental.pallas import tpu as pltpu

NUM_NODES = 15   # the DGL graph in the original model has 15 nodes per sample
NC_PAD = 128     # lane-dense classifier width (real classes sliced in wrapper)


# --------------------------------------------------------------------------- #
# Fused per-batch-tile kernel.  Everything stays resident in VMEM/vregs.
#   x_ref    : (Bt*N, HW*C)  bf16   raw pixels, rows batch-major (b*N + n)
#   ops_ref  : (Bt*N+Bt, Bt*N) bf16 [kron(I_Bt, adj) ; node-sum selector]
#   wcomb_ref: (HW*C, h0)    bf16   avg-pool + head-linear + gcn1-linear fused
#   w2_ref   : (h0, h1)      bf16
#   wc_ref   : (h1, NC_PAD)  bf16   classifier weight / N, zero-padded
#   vec_ref  : (Bt*N+4, 128) f32    [t1 per-node shift ; s1 ; s2 ; t2 ; bc]
#   out_ref  : (Bt, NC_PAD)  f32
# --------------------------------------------------------------------------- #
def _fused_gcn_kernel(h0, h1, btn, bt,
                      x_ref, ops_ref, wcomb_ref, w2_ref, wc_ref, vec_ref,
                      out_ref):
    f32, bf16 = jnp.float32, jnp.bfloat16

    # Static slices of the packed operator / vector slabs (cheap, in-VMEM).
    adj = ops_ref[0:btn, :]                  # (btn, btn) block-diag adjacency
    pool = ops_ref[btn:btn + bt, :]          # (bt, btn)  per-sample node sum
    t1 = vec_ref[0:btn, :h0]                 # per-node folded shift (layer 1)
    s1 = vec_ref[btn:btn + 1, :h0]
    s2 = vec_ref[btn + 1:btn + 2, :h1]
    t2 = vec_ref[btn + 2:btn + 3, :h1]
    bc = vec_ref[btn + 3:btn + 4, :]         # (1, NC_PAD)

    # Head (spatial avg-pool folded into K) fused with GCN layer-1 linear.
    p = jnp.dot(x_ref[...], wcomb_ref[...], preferred_element_type=f32)

    # ---- GCN layer 1: aggregate -> affine(BN + folded biases) -> ReLU ----
    z1 = jnp.dot(adj, p.astype(bf16), preferred_element_type=f32)
    y1 = jnp.maximum(z1 * s1 + t1, 0.0)

    # ---- GCN layer 2: aggregate -> linear -> affine -> ReLU ----
    q = jnp.dot(adj, y1.astype(bf16), preferred_element_type=f32)
    z2 = jnp.dot(q.astype(bf16), w2_ref[...], preferred_element_type=f32)
    y2 = jnp.maximum(z2 * s2 + t2, 0.0)

    # ---- node-mean readout (1/N folded into wc) + classifier ----
    pooled = jnp.dot(pool, y2.astype(bf16), preferred_element_type=f32)
    out_ref[...] = jnp.dot(pooled.astype(bf16), wc_ref[...],
                           preferred_element_type=f32) + bc


# --------------------------------------------------------------------------- #
# One-time parameter / operator preparation (hoisted out of the forward).
# --------------------------------------------------------------------------- #
def prepare_gcn(params, adj, *, batch, height, width, channels, bt=None):
    N = NUM_NODES
    B = batch
    HW = height * width
    assert params["w_feat"].shape[0] == channels

    # Batch tile: for the small test B<=8 -> one tile; larger batches use
    # 8-sample tiles (keeps the per-tile aggregation operator tiny and the
    # row tile a multiple of 8 sublanes).
    if bt is None:
        bt = B if B <= 8 else 8
    assert B % bt == 0, "batch must be divisible by the batch tile"
    btn = bt * N

    f32, bf16 = jnp.float32, jnp.bfloat16
    adj = adj.astype(f32)
    deg = jnp.sum(adj, axis=1, keepdims=True)                     # (N, 1)

    h0 = params["w1"].shape[1]
    h1 = params["w2"].shape[1]
    nc = params["wc"].shape[1]
    assert h0 <= NC_PAD and h1 <= NC_PAD and nc <= NC_PAD

    # Fold the spatial mean into the head weight, then fuse it with w1.
    w_feat_t = jnp.tile(params["w_feat"], (HW, 1)) / float(HW)    # (HW*C, F)
    wcomb = (w_feat_t @ params["w1"]).astype(bf16)                # (HW*C, h0)

    # Eval-mode BN affine folded with the linear biases.  The head bias goes
    # through the aggregation -> picks up the node in-degree.
    s1 = params["bn1_scale"]                                      # (1, h0)
    t1_node = (deg * (params["b_feat"] @ params["w1"]) + params["b1"]) * s1 \
        + params["bn1_shift"]                                     # (N, h0)
    t1_tile = jnp.tile(t1_node, (bt, 1))                          # (btn, h0)
    s2 = params["bn2_scale"]
    t2 = params["b2"] * s2 + params["bn2_shift"]                  # (1, h1)

    # Classifier: fold 1/N node-mean into the weight, pad lane-dense to 128.
    wc_pad = jnp.zeros((h1, NC_PAD), f32).at[:, :nc].set(params["wc"] / N)
    bc_pad = jnp.zeros((1, NC_PAD), f32).at[:, :nc].set(params["bc"])

    # Block-structured per-tile aggregation + readout operators (0/1 entries,
    # exact in bf16).  Size depends only on the tile, not the full batch.
    adj_blk = jnp.kron(jnp.eye(bt, dtype=f32), adj)               # (btn, btn)
    pool_blk = jnp.kron(jnp.eye(bt, dtype=f32),
                        jnp.ones((1, N), f32))                    # (bt, btn)
    ops = jnp.concatenate([adj_blk, pool_blk], axis=0).astype(bf16)

    # Pack all small f32 vectors into one slab -> one DMA.
    vec = jnp.zeros((btn + 4, NC_PAD), f32)
    vec = vec.at[0:btn, :h0].set(t1_tile)
    vec = vec.at[btn, :h0].set(s1[0])
    vec = vec.at[btn + 1, :h1].set(s2[0])
    vec = vec.at[btn + 2, :h1].set(t2[0])
    vec = vec.at[btn + 3, :].set(bc_pad[0])

    return dict(bt=bt, h0=h0, h1=h1, nc=nc,
                ops=ops, wcomb=wcomb,
                w2=params["w2"].astype(bf16), wc=wc_pad.astype(bf16),
                vec=vec)


# --------------------------------------------------------------------------- #
# Forward pass: one pallas_call; the only per-call XLA ops are reshape + cast.
# --------------------------------------------------------------------------- #
def gcn_forward(prep, feat):
    B, N, Hs, Ws, C = feat.shape
    assert N == NUM_NODES
    bt, h0, h1, nc = prep["bt"], prep["h0"], prep["h1"], prep["nc"]
    btn = bt * N
    hwc = Hs * Ws * C
    assert B % bt == 0

    # Rows batch-major (b*N + n): the natural flatten, no transpose needed.
    x = feat.reshape(B * N, hwc).astype(jnp.bfloat16)

    kernel = partial(_fused_gcn_kernel, h0, h1, btn, bt)
    inv = lambda i: (0, 0)   # grid-invariant blocks: DMA'd once, stay resident

    out_pad = pl.pallas_call(
        kernel,
        out_shape=jax.ShapeDtypeStruct((B, NC_PAD), jnp.float32),
        grid=(B // bt,),
        in_specs=[
            pl.BlockSpec((btn, hwc), lambda i: (i, 0)),   # streamed x row tile
            pl.BlockSpec(prep["ops"].shape, inv),
            pl.BlockSpec(prep["wcomb"].shape, inv),
            pl.BlockSpec(prep["w2"].shape, inv),
            pl.BlockSpec(prep["wc"].shape, inv),
            pl.BlockSpec(prep["vec"].shape, inv),
        ],
        out_specs=pl.BlockSpec((bt, NC_PAD), lambda i: (i, 0)),
        compiler_params=pltpu.CompilerParams(
            # parallel batch axis -> both v7x TensorCores; harmless on v5e/v6e.
            dimension_semantics=("parallel",),
            # 32 MiB fits every chip's scoped budget (v7x physical is 64 MiB);
            # actual footprint here is far below that.
            vmem_limit_bytes=32 * 1024 * 1024),
    )(x, prep["ops"], prep["wcomb"], prep["w2"], prep["wc"], prep["vec"])

    return out_pad[:, :nc]


# --------------------------------------------------------------------------- #
# Deterministic parameter init (PyTorch-style uniform(+-1/sqrt(fan_in)))
# --------------------------------------------------------------------------- #
def init_params(key, in_feats, hidden, num_classes, c_in=3):
    keys = jax.random.split(key, 12)

    def lin(kw, kb, fi, fo):
        lim = 1.0 / np.sqrt(fi)
        w = jax.random.uniform(kw, (fi, fo), jnp.float32, -lim, lim)
        b = jax.random.uniform(kb, (1, fo), jnp.float32, -lim, lim)
        return w, b

    def bn(kg, kb, n, eps=1e-5):
        gamma = jax.random.uniform(kg, (1, n), jnp.float32, 0.5, 1.5)
        beta = 0.1 * jax.random.normal(kb, (1, n), jnp.float32)
        running_mean = jnp.zeros((1, n), jnp.float32)
        running_var = jnp.ones((1, n), jnp.float32)
        scale = gamma / jnp.sqrt(running_var + eps)
        shift = beta - running_mean * scale
        return scale, shift

    w_feat, b_feat = lin(keys[0], keys[1], c_in, in_feats)
    w1, b1 = lin(keys[2], keys[3], in_feats, hidden[0])
    w2, b2 = lin(keys[4], keys[5], hidden[0], hidden[1])
    wc, bc = lin(keys[6], keys[7], hidden[1], num_classes)
    bn1_scale, bn1_shift = bn(keys[8], keys[9], hidden[0])
    bn2_scale, bn2_shift = bn(keys[10], keys[11], hidden[1])

    return dict(w_feat=w_feat, b_feat=b_feat,
                w1=w1, b1=b1, w2=w2, b2=b2, wc=wc, bc=bc,
                bn1_scale=bn1_scale, bn1_shift=bn1_shift,
                bn2_scale=bn2_scale, bn2_shift=bn2_shift)


# --------------------------------------------------------------------------- #
# Plain-JAX f32 reference (mirrors the PyTorch module's forward, eval mode)
# --------------------------------------------------------------------------- #
def reference(params, adj, feat):
    B = feat.shape[0]
    imgs = feat.reshape(B * NUM_NODES, -1, feat.shape[-1]).astype(jnp.float32)
    h = imgs.mean(axis=1) @ params["w_feat"] + params["b_feat"]
    h = h.reshape(B, NUM_NODES, -1).transpose(1, 0, 2)            # (15, B, F)

    def layer(h, w, b, scale, shift):
        agg = jnp.einsum("nm,mbf->nbf", adj, h)
        z = agg @ w + b
        z = z * scale + shift
        return jnp.maximum(z, 0.0)

    h = layer(h, params["w1"], params["b1"],
              params["bn1_scale"], params["bn1_shift"])
    h = layer(h, params["w2"], params["b2"],
              params["bn2_scale"], params["bn2_shift"])
    pooled = h.mean(axis=0)
    return pooled @ params["wc"] + params["bc"]


if __name__ == "__main__":
    key = jax.random.PRNGKey(0)
    k_feat, k_param = jax.random.split(key)

    # Small shapes consistent with the module's forward:
    #   feat: (batch, 15 nodes, H, W, C)
    B, Hs, Ws, C = 2, 8, 8, 3
    in_feats, hidden, num_classes = 16, (32, 32), 5

    feat = jax.random.normal(k_feat, (B, NUM_NODES, Hs, Ws, C), jnp.float32)
    params = init_params(k_param, in_feats, hidden, num_classes, c_in=C)

    # Deterministic graph over the 15 nodes: undirected ring -> adjacency
    # a[dst, src] = 1 for each edge src->dst (DGL sum-of-messages semantics).
    adj_np = np.zeros((NUM_NODES, NUM_NODES), np.float32)
    for i in range(NUM_NODES):
        adj_np[(i + 1) % NUM_NODES, i] = 1.0
        adj_np[(i - 1) % NUM_NODES, i] = 1.0
    adj = jnp.asarray(adj_np)

    # One-time prep (weight fusion, operator construction) hoisted out of the
    # forward; the forward itself only reshapes/casts x and runs the kernel.
    prep = prepare_gcn(params, adj, batch=B, height=Hs, width=Ws, channels=C)

    out = jax.block_until_ready(gcn_forward(prep, feat))
    ref = jax.block_until_ready(reference(params, adj, feat))

    assert out.shape == (B, num_classes), out.shape
    # bf16 MXU operands vs. pure-f32 reference -> loosened tolerance.
    np.testing.assert_allclose(np.asarray(out), np.asarray(ref),
                               rtol=5e-2, atol=5e-2)
    print("KERNEL_OK")
</pallas_src>

<mosaic_0001>
module attributes {stable_mosaic.version = 11 : i64} {
  func.func @_fused_gcn_kernel(%arg0: i32, %arg1: memref<30x192xbf16, #tpu.memory_space<vmem>>, %arg2: memref<32x30xbf16, #tpu.memory_space<vmem>>, %arg3: memref<192x32xbf16, #tpu.memory_space<vmem>>, %arg4: memref<32x32xbf16, #tpu.memory_space<vmem>>, %arg5: memref<32x128xbf16, #tpu.memory_space<vmem>>, %arg6: memref<34x128xf32, #tpu.memory_space<vmem>>, %arg7: memref<2x128xf32, #tpu.memory_space<vmem>>) attributes {dimension_semantics = [#tpu.dimension_semantics<parallel>], iteration_bounds = array<i64: 1>, scalar_prefetch = 0 : i64, scratch_operands = 0 : i64, tpu.core_type = #tpu.core_type<tc>, window_params = [{transform_indices = @transform_0, window_bounds = array<i64: 30, 192>}, {pipeline_mode = #tpu.pipeline_mode<synchronous>, transform_indices = @transform_1, window_bounds = array<i64: 32, 30>}, {pipeline_mode = #tpu.pipeline_mode<synchronous>, transform_indices = @transform_2, window_bounds = array<i64: 192, 32>}, {pipeline_mode = #tpu.pipeline_mode<synchronous>, transform_indices = @transform_3, window_bounds = array<i64: 32, 32>}, {pipeline_mode = #tpu.pipeline_mode<synchronous>, transform_indices = @transform_4, window_bounds = array<i64: 32, 128>}, {pipeline_mode = #tpu.pipeline_mode<synchronous>, transform_indices = @transform_5, window_bounds = array<i64: 34, 128>}, {transform_indices = @transform_6, window_bounds = array<i64: 2, 128>}]} {
    %c0 = arith.constant 0 : index
    %c0_0 = arith.constant 0 : index
    %0 = vector.load %arg2[%c0, %c0_0] : memref<32x30xbf16, #tpu.memory_space<vmem>>, vector<30x30xbf16>
    %c30 = arith.constant 30 : index
    %c0_1 = arith.constant 0 : index
    %1 = vector.load %arg2[%c30, %c0_1] : memref<32x30xbf16, #tpu.memory_space<vmem>>, vector<2x30xbf16>
    %c0_2 = arith.constant 0 : index
    %c0_3 = arith.constant 0 : index
    %2 = vector.load %arg6[%c0_2, %c0_3] : memref<34x128xf32, #tpu.memory_space<vmem>>, vector<30x32xf32>
    %c30_4 = arith.constant 30 : index
    %c0_5 = arith.constant 0 : index
    %3 = vector.load %arg6[%c30_4, %c0_5] : memref<34x128xf32, #tpu.memory_space<vmem>>, vector<1x32xf32>
    %c31 = arith.constant 31 : index
    %c0_6 = arith.constant 0 : index
    %4 = vector.load %arg6[%c31, %c0_6] : memref<34x128xf32, #tpu.memory_space<vmem>>, vector<1x32xf32>
    %c32 = arith.constant 32 : index
    %c0_7 = arith.constant 0 : index
    %5 = vector.load %arg6[%c32, %c0_7] : memref<34x128xf32, #tpu.memory_space<vmem>>, vector<1x32xf32>
    %c33 = arith.constant 33 : index
    %c0_8 = arith.constant 0 : index
    %6 = vector.load %arg6[%c33, %c0_8] : memref<34x128xf32, #tpu.memory_space<vmem>>, vector<1x128xf32>
    %c0_9 = arith.constant 0 : index
    %c0_10 = arith.constant 0 : index
    %7 = vector.load %arg1[%c0_9, %c0_10] : memref<30x192xbf16, #tpu.memory_space<vmem>>, vector<30x192xbf16>
    %c0_11 = arith.constant 0 : index
    %c0_12 = arith.constant 0 : index
    %8 = vector.load %arg3[%c0_11, %c0_12] : memref<192x32xbf16, #tpu.memory_space<vmem>>, vector<192x32xbf16>
    %cst = arith.constant dense<0.000000e+00> : vector<30x32xf32>
    %9 = tpu.matmul %7, %8, %cst {dimension_numbers = #tpu.dot_dimension_numbers<[1], [0], [0], [1], [0, 0, 1, 1], [], []>} : vector<30x192xbf16>, vector<192x32xbf16>, vector<30x32xf32> -> vector<30x32xf32>
    %10 = arith.truncf %9 : vector<30x32xf32> to vector<30x32xbf16>
    %cst_13 = arith.constant dense<0.000000e+00> : vector<30x32xf32>
    %11 = tpu.matmul %0, %10, %cst_13 {dimension_numbers = #tpu.dot_dimension_numbers<[1], [0], [0], [1], [0, 0, 1, 1], [], []>} : vector<30x30xbf16>, vector<30x32xbf16>, vector<30x32xf32> -> vector<30x32xf32>
    %12 = vector.broadcast %3 : vector<1x32xf32> to vector<30x32xf32>
    %13 = arith.mulf %11, %12 : vector<30x32xf32>
    %14 = arith.addf %13, %2 : vector<30x32xf32>
    %cst_14 = arith.constant 0.000000e+00 : f32
    %15 = vector.broadcast %cst_14 : f32 to vector<30x32xf32>
    %16 = arith.maximumf %14, %15 : vector<30x32xf32>
    %17 = arith.truncf %16 : vector<30x32xf32> to vector<30x32xbf16>
    %cst_15 = arith.constant dense<0.000000e+00> : vector<30x32xf32>
    %18 = tpu.matmul %0, %17, %cst_15 {dimension_numbers = #tpu.dot_dimension_numbers<[1], [0], [0], [1], [0, 0, 1, 1], [], []>} : vector<30x30xbf16>, vector<30x32xbf16>, vector<30x32xf32> -> vector<30x32xf32>
    %19 = arith.truncf %18 : vector<30x32xf32> to vector<30x32xbf16>
    %c0_16 = arith.constant 0 : index
    %c0_17 = arith.constant 0 : index
    %20 = vector.load %arg4[%c0_16, %c0_17] : memref<32x32xbf16, #tpu.memory_space<vmem>>, vector<32x32xbf16>
    %cst_18 = arith.constant dense<0.000000e+00> : vector<30x32xf32>
    %21 = tpu.matmul %19, %20, %cst_18 {dimension_numbers = #tpu.dot_dimension_numbers<[1], [0], [0], [1], [0, 0, 1, 1], [], []>} : vector<30x32xbf16>, vector<32x32xbf16>, vector<30x32xf32> -> vector<30x32xf32>
    %22 = vector.broadcast %4 : vector<1x32xf32> to vector<30x32xf32>
    %23 = arith.mulf %21, %22 : vector<30x32xf32>
    %24 = vector.broadcast %5 : vector<1x32xf32> to vector<30x32xf32>
    %25 = arith.addf %23, %24 : vector<30x32xf32>
    %cst_19 = arith.constant 0.000000e+00 : f32
    %26 = vector.broadcast %cst_19 : f32 to vector<30x32xf32>
    %27 = arith.maximumf %25, %26 : vector<30x32xf32>
    %28 = arith.truncf %27 : vector<30x32xf32> to vector<30x32xbf16>
    %cst_20 = arith.constant dense<0.000000e+00> : vector<2x32xf32>
    %29 = tpu.matmul %1, %28, %cst_20 {dimension_numbers = #tpu.dot_dimension_numbers<[1], [0], [0], [1], [0, 0, 1, 1], [], []>} : vector<2x30xbf16>, vector<30x32xbf16>, vector<2x32xf32> -> vector<2x32xf32>
    %30 = arith.truncf %29 : vector<2x32xf32> to vector<2x32xbf16>
    %c0_21 = arith.constant 0 : index
    %c0_22 = arith.constant 0 : index
    %31 = vector.load %arg5[%c0_21, %c0_22] : memref<32x128xbf16, #tpu.memory_space<vmem>>, vector<32x128xbf16>
    %cst_23 = arith.constant dense<0.000000e+00> : vector<2x128xf32>
    %32 = tpu.matmul %30, %31, %cst_23 {dimension_numbers = #tpu.dot_dimension_numbers<[1], [0], [0], [1], [0, 0, 1, 1], [], []>} : vector<2x32xbf16>, vector<32x128xbf16>, vector<2x128xf32> -> vector<2x128xf32>
    %33 = vector.broadcast %6 : vector<1x128xf32> to vector<2x128xf32>
    %34 = arith.addf %32, %33 : vector<2x128xf32>
    %c0_24 = arith.constant 0 : index
    %c0_25 = arith.constant 0 : index
    %35 = vector.load %arg7[%c0_24, %c0_25] : memref<2x128xf32, #tpu.memory_space<vmem>>, vector<2x128xf32>
    tpu.vector_store %arg7[%c0_24, %c0_25], %34 {strides = array<i32>} : memref<2x128xf32, #tpu.memory_space<vmem>>, vector<2x128xf32>,
    return
  }
  func.func @transform_0(%arg0: i32) -> (i32, i32) {
    %c0_i32 = arith.constant 0 : i32
    %c0_i32_0 = arith.constant 0 : i32
    return %arg0, %c0_i32 : i32, i32
  }
  func.func @transform_1(%arg0: i32) -> (i32, i32) {
    %c0_i32 = arith.constant 0 : i32
    %c0_i32_0 = arith.constant 0 : i32
    %c0_i32_1 = arith.constant 0 : i32
    return %c0_i32, %c0_i32_0 : i32, i32
  }
  func.func @transform_2(%arg0: i32) -> (i32, i32) {
    %c0_i32 = arith.constant 0 : i32
    %c0_i32_0 = arith.constant 0 : i32
    %c0_i32_1 = arith.constant 0 : i32
    return %c0_i32, %c0_i32_0 : i32, i32
  }
  func.func @transform_3(%arg0: i32) -> (i32, i32) {
    %c0_i32 = arith.constant 0 : i32
    %c0_i32_0 = arith.constant 0 : i32
    %c0_i32_1 = arith.constant 0 : i32
    return %c0_i32, %c0_i32_0 : i32, i32
  }
  func.func @transform_4(%arg0: i32) -> (i32, i32) {
    %c0_i32 = arith.constant 0 : i32
    %c0_i32_0 = arith.constant 0 : i32
    %c0_i32_1 = arith.constant 0 : i32
    return %c0_i32, %c0_i32_0 : i32, i32
  }
  func.func @transform_5(%arg0: i32) -> (i32, i32) {
    %c0_i32 = arith.constant 0 : i32
    %c0_i32_0 = arith.constant 0 : i32
    %c0_i32_1 = arith.constant 0 : i32
    return %c0_i32, %c0_i32_0 : i32, i32
  }
  func.func @transform_6(%arg0: i32) -> (i32, i32) {
    %c0_i32 = arith.constant 0 : i32
    %c0_i32_0 = arith.constant 0 : i32
    return %arg0, %c0_i32 : i32, i32
  }
}

</mosaic_0001>

<bundles_post_ra>
// kernel: tpu_custom_call.1
= control target key start
LH: loop header
LB: loop body
LE: loop exit
PB: predicated region body
PF: predicated region fallthrough
CT: control target
= control target key end

     0   :  { %v727_v1 = vmov 0   ;;  %vm156_vm0 = vcmask 523264   ;;  %s879_s0 = inlined_call_operand.vmem [shape: bf16[30,192], index: 0, kind: input, shape index: {}]   ;;  %s880_s1 = inlined_call_operand.vmem [shape: bf16[32,30], index: 1, kind: input, shape index: {}]   ;;  %s881_s2 = inlined_call_operand.vmem [shape: bf16[192,32], index: 2, kind: input, shape index: {}]   ;;  %s882_s3 = inlined_call_operand.vmem [shape: bf16[32,32], index: 3, kind: input, shape index: {}]   ;;  %s883_s4 = inlined_call_operand.vmem [shape: bf16[32,128], index: 4, kind: input, shape index: {}]   ;;  %s884_s5 = inlined_call_operand.vmem [shape: f32[34,128], index: 5, kind: input, shape index: {}]   ;;  %s885_s6 = inlined_call_operand.hbm [shape: f32[2,128], index: 6, kind: output, shape index: {}]  }
   0x1   :  { %v680_v0 = vld [vmem:[%s881_s2 + $0x38] sm:$0xff]   ;;  %163 = vmatprep.subr.bf16.mxu0 %v727_v1  ;;  %v681_v2 = vld [vmem:[%s881_s2 + $0x30] sm:$0xff]   ;;  %v682_v3 = vld [vmem:[%s881_s2 + $0x28] sm:$0xff]  }
   0x2   :  { %164 = vmatpush1.bf16.msra.mxu0 %v680_v0  ;;  %v683_v4 = vld [vmem:[%s881_s2 + $0x20] sm:$0xff]   ;;  %v684_v6 = vld [vmem:[%s881_s2 + $0x18] sm:$0xff]   ;;  %v685_v7 = vld [vmem:[%s881_s2 + $0x10] sm:$0xff]  }
   0x3   :  { %165 = vmatprep.subr.bf16.mxu0 %v727_v1  ;;  %v694_v5 = vld [vmem:[%s879_s0 + $0x4] ss:$8 sps:$4 sm:$0xff]  }
   0x4   :  { %595 = vmatprep.mubr.msk.bf16.mxu0 %vm156_vm0, %v694_v5 }
   0x6   :  { %166 = vmatpush1.bf16.msra.mxu0 %v681_v2 }
   0x7   :  { %167 = vmatprep.subr.bf16.mxu0 %v727_v1 }
   0xa   :  { %168 = vmatpush1.bf16.msra.mxu0 %v682_v3 }
   0xb   :  { %169 = vmatprep.subr.bf16.mxu0 %v727_v1 }
   0xe   :  { %170 = vmatpush1.bf16.msra.mxu0 %v683_v4 }
   0xf   :  { %171 = vmatprep.subr.bf16.mxu0 %v727_v1 }
  0x12   :  { %172 = vmatpush1.bf16.msra.mxu0 %v684_v6 }
  0x13   :  { %173 = vmatprep.subr.bf16.mxu0 %v727_v1 }
  0x14   :  { %11 = vsyncpa [#allocation3], 0  ;;  %v686_v8 = vld [vmem:[%s881_s2 + $0x8] sm:$0xff]   ;;  %v687_v9 = vld [vmem:[%s881_s2] sm:$0xff]   ;;  %vm224_vm1 = vcmask 244736   ;;  %vm231_vm2 = vcmask 1046528  }
  0x15   :  { %v688_v10 = vld [vmem:[%s881_s2 + $0x58] sm:$0xff]   ;;  %v689_v11 = vld [vmem:[%s881_s2 + $0x50] sm:$0xff]   ;;  %v690_v12 = vld [vmem:[%s881_s2 + $0x48] sm:$0xff]   ;;  %vm372_vm3 = vcmask 261120   ;;  %v728_v62 = vmov 0.0   ;;  %vm729_vm4 = vmmov 0  }
  0x16   :  { %174 = vmatpush1.bf16.msra.mxu0 %v685_v7  ;;  %v691_v13 = vld [vmem:[%s881_s2 + $0x40] sm:$0xff]   ;;  %v695_v15 = vld [vmem:[%s879_s0 + $0x14] ss:$8 sps:$4 sm:$0x7f]   ;;  %v699_v29 = vld [vmem:[%s880_s1 + $0x8] sm:$0x7f]  }
  0x17   :  { %175 = vmatprep.subr.bf16.mxu0 %v727_v1  ;;  %v692_v14 = vld [vmem:[%s879_s0] ss:$8 sps:$4 sm:$0xff]   ;;  %v697_v16 = vld [vmem:[%s879_s0 + $0x10] ss:$8 sps:$4 sm:$0x7f]   ;;  %s730_s0 = smov [#allocation2]  }
  0x18   :  { %v698_v17 = vld [vmem:[%s880_s1] sm:$0xff]   ;;  %v601_v30 = vld [vmem:[%s884_s5 + $0x1e] ss:$0 sm:$0xff]  ;;  %v32_v33 = vld [vmem:[%s884_s5 + $0x10] sm:$0xff]  ;;  %s571_s30 = sshll.u32 %s730_s0, 4  ;;  %s572_s30 = int_to_ptr.vmem [resolvable:$true] %s571_s30 }
  0x19   :  { %638 = vmatprep.mubr.msk.bf16.mxu1 %vm224_vm1, %v698_v17  ;;  %v30_v36 = vld [vmem:[%s884_s5] sm:$0xff]  ;;  %v33_v37 = vld [vmem:[%s884_s5 + $0x18] sm:$0x3f]  ;;  %v31_v41 = vld [vmem:[%s884_s5 + $0x8] sm:$0xff]  ;;  %p710_p1 = scmp.lt.s32.totalorder %s572_s30, %s572_s30 }
  0x1a   :  { %176 = vmatpush1.bf16.msra.mxu0 %v686_v8  ;;  %v700_v54 = vld [vmem:[%s882_s3 + $0x8] sm:$0xff]   ;;  %v701_v55 = vld [vmem:[%s882_s3] sm:$0xff]   ;;  %v608_v63 = vld [vmem:[%s884_s5 + $0x1f] ss:$0 sm:$0xff] }
  0x1b   :  { %177 = vmatprep.subr.bf16.mxu0 %v727_v1  ;;  %v609_v2 = vld [vmem:[%s884_s5 + $0x20] ss:$0 sm:$0xff] }
  0x1e   :  { %178 = vmatpush1.bf16.msra.mxu0 %v687_v9 }
  0x1f   :  { %187 = vmatprep.subr.bf16.mxu0 %v727_v1 }
  0x22   :  { %188 = vmatpush2.bf16.msra.mxu0 %v688_v10 }
  0x23   :  { %189 = vmatprep.subr.bf16.mxu0 %v727_v1 }
  0x26   :  { %190 = vmatpush2.bf16.msra.mxu0 %v689_v11 }
  0x27   :  { %191 = vmatprep.subr.bf16.mxu0 %v727_v1 }
  0x2a   :  { %192 = vmatpush2.bf16.msra.mxu0 %v690_v12 }
  0x2b   :  { %193 = vmatprep.subr.bf16.mxu0 %v727_v1 }
  0x2e   :  { %194 = vmatpush2.bf16.msra.mxu0 %v691_v13 }
  0x31   :  { %196 = vmatmul.mubr.bf16.vlgmr.msra.gmra.mxu0 %v692_v14 }
  0x32   :  { %596 = vmatprep.mubr.msk.bf16.mxu0 %vm156_vm0, %v695_v15 }
  0x39   :  { %204 = vmatmul.mubr.bf16.gmra.mxu0 %v697_v16 }
  0xf1   :  { %v197_v18 = vpop.f32.mrf.mxu0 }
  0xf3   :  { %v199_v19 = vpop.f32.mrf.mxu0 }
  0xf5   :  { %v200_v20 = vpop.f32.mrf.mxu0 }
  0xf6   :  { %v212_v27 = vpack.c.bf16 %v200_v20, %v197_v18  ;;  %v702_v18 = vld [vmem:[%s880_s1 + $0xc] ss:$0 sps:$4 sm:$0x88]  }
  0xf7   :  { %v202_v21 = vpop.f32.mrf.mxu0 }
  0xf8   :  { %v453_v21 = vrot.slane %v702_v18, 3 }
  0xf9   :  { %v205_v22 = vpop.f32.mrf.mxu0 }
  0xfb   :  { %v207_v23 = vpop.f32.mrf.mxu0 }
  0xfc   :  { %v704_v23 = vld [vmem:[%s883_s4] sm:$0xff]  }
  0xfd   :  { %v208_v24 = vpop.f32.mrf.mxu0 }
  0xfe   :  { %v213_v25 = vpack.c.bf16 %v208_v24, %v205_v22  ;;  %v703_v22 = vld [vmem:[%s883_s4 + $0x8] sm:$0xff]   ;;  %s705_s4 = scalar_lea.vmem %s572_s30, 32 }
  0xff   :  { %v210_v26 = vpop.f32.mrf.mxu0  ;;  %p706_p0 = scmp.ne.s32.totalorder %s572_s30, %s705_s4  ;;  %p711_p2 = scmp.lt.s32.totalorder %s705_s4, %s705_s4 }
 0x100   :  { %674 = vmatprep.subr.msk.bf16.mxu1 %vm231_vm2, %v213_v25  ;;  %v233_v28 = vsel %vm231_vm2, %v213_v25, 0 }
 0x101   :  { %635 = vmatpush3.bf16.msra.mxu1 %v233_v28  ;;  %p712_p3 = por %p711_p2, %p710_p1 }
 0x102   :  { %636 = vmatprep.subr.bf16.mxu1 %v212_v27 }
 0x103   :  { %p713_p4 = pnand %p712_p3, %p706_p0 }
 0x105   :  { %637 = vmatpush3.bf16.msra.mxu1 %v212_v27 }
 0x108   :  { %639 = vmatmul.mubr.msk.bf16.vlgmr.msra.gmra.mxu1 %vm224_vm1, %v699_v29 }
 0x109   :  { %646 = vmatprep.mubr.msk.bf16.mxu1 %vm224_vm1, %v698_v17 }
 0x1c8   :  { %v640_v31 = vpop.f32.mrf.mxu1 }
 0x1c9   :  { %v290_v32 = vmul.f32 %v640_v31, %v601_v30 }
 0x1ca   :  { %v269_v34 = vpop.f32.mrf.mxu1 }
 0x1cb   :  { %v288_v35 = vmul.f32 %v601_v30, %v269_v34  ;;  %v294_v39 = vadd.f32 %v290_v32, %v32_v33 }
 0x1cc   :  { %v641_v38 = vpop.f32.mrf.mxu1 }
 0x1cd   :  { %v291_v40 = vmul.f32 %v641_v38, %v601_v30  ;;  %v292_v43 = vadd.f32 %v288_v35, %v30_v36  ;;  %v298_v46 = vmax.f32 %v294_v39, 0.0 }
 0x1ce   :  { %v272_v42 = vpop.f32.mrf.mxu1 }
 0x1cf   :  { %v295_v44 = vadd.f32 %v291_v40, %v33_v37  ;;  %v289_v45 = vmul.f32 %v601_v30, %v272_v42  ;;  %v296_v49 = vmax.f32 %v292_v43, 0.0 }
 0x1d1   :  { %v299_v47 = vmax.f32 %v295_v44, 0.0  ;;  %v293_v48 = vadd.f32 %v289_v45, %v31_v41 }
 0x1d3   :  { %v301_v50 = vpack.c.bf16 %v299_v47, %v298_v46  ;;  %v297_v51 = vmax.f32 %v293_v48, 0.0 }
 0x1d5   :  { %675 = vmatprep.subr.msk.bf16.mxu1 %vm231_vm2, %v301_v50  ;;  %v303_v52 = vsel %vm231_vm2, %v301_v50, 0  ;;  %v300_v53 = vpack.c.bf16 %v297_v51, %v296_v49 }
 0x1d6   :  { %643 = vmatpush3.bf16.msra.mxu1 %v303_v52 }
 0x1d7   :  { %644 = vmatprep.subr.bf16.mxu1 %v300_v53 }
 0x1da   :  { %645 = vmatpush3.bf16.msra.mxu1 %v300_v53 }
 0x1db   :  { %650 = vmatprep.subr.bf16.mxu1 %v700_v54 }
 0x1dd   :  { %647 = vmatmul.mubr.msk.bf16.vlgmr.msra.gmra.mxu1 %vm224_vm1, %v699_v29  ;;  %v612_v29 = vld [vmem:[%s884_s5 + $0x21] ss:$0 sm:$0xff] }
 0x1de   :  { %651 = vmatpush3.bf16.msra.mxu1 %v700_v54 }
 0x1df   :  { %652 = vmatprep.subr.bf16.mxu1 %v701_v55 }
 0x1e2   :  { %653 = vmatpush3.bf16.msra.mxu1 %v701_v55 }
 0x1e3   :  { %658 = vmatprep.subr.bf16.mxu1 %v728_v62 }
 0x29d   :  { %v648_v56 = vpop.f32.mrf.mxu1 }
 0x29f   :  { %v339_v57 = vpop.f32.mrf.mxu1 }
 0x2a1   :  { %v649_v58 = vpop.f32.mrf.mxu1 }
 0x2a2   :  { %v355_v61 = vpack.c.bf16 %v649_v58, %v648_v56 }
 0x2a3   :  { %v342_v59 = vpop.f32.mrf.mxu1 }
 0x2a4   :  { %v354_v60 = vpack.c.bf16 %v342_v59, %v339_v57 }
 0x2a6   :  { %654 = vmatprep.mubr.msk.bf16.mxu1 %vm372_vm3, %v354_v60 }
 0x2a7   :  { %655 = vmatmul.mubr.msk.bf16.vlgmr.msra.gmra.mxu1 %vm372_vm3, %v355_v61 }
 0x2a8   :  { %662 = vmatprep.mubr.msk.bf16.mxu1 %vm729_vm4, %v728_v62 }
 0x367   :  { %v656_v0 = vpop.f32.mrf.mxu1 }
 0x368   :  { %v434_v1 = vmul.f32 %v656_v0, %v608_v63 }
 0x369   :  { %v413_v3 = vpop.f32.mrf.mxu1 }
 0x36a   :  { %v442_v5 = vadd.f32 %v609_v2, %v434_v1  ;;  %v432_v7 = vmul.f32 %v608_v63, %v413_v3 }
 0x36b   :  { %v657_v4 = vpop.f32.mrf.mxu1 }
 0x36c   :  { %v435_v6 = vmul.f32 %v657_v4, %v608_v63  ;;  %v446_v11 = vmax.f32 %v442_v5, 0.0  ;;  %v440_v14 = vadd.f32 %v609_v2, %v432_v7 }
 0x36d   :  { %v416_v8 = vpop.f32.mrf.mxu1 }
 0x36e   :  { %v443_v9 = vadd.f32 %v609_v2, %v435_v6  ;;  %v433_v10 = vmul.f32 %v608_v63, %v416_v8  ;;  %v444_v19 = vmax.f32 %v440_v14, 0.0 }
 0x370   :  { %v447_v12 = vmax.f32 %v443_v9, 0.0  ;;  %v441_v13 = vadd.f32 %v609_v2, %v433_v10 }
 0x372   :  { %v449_v15 = vpack.c.bf16 %v447_v12, %v446_v11  ;;  %v445_v16 = vmax.f32 %v441_v13, 0.0 }
 0x374   :  { %v458_v17 = vsel %vm231_vm2, %v449_v15, 0  ;;  %v448_v20 = vpack.c.bf16 %v445_v16, %v444_v19 }
 0x375   :  { %659 = vmatpush3.bf16.msra.mxu1 %v458_v17 }
 0x376   :  { %660 = vmatprep.subr.bf16.mxu1 %v728_v62 }
 0x379   :  { %661 = vmatpush3.bf16.msra.mxu1 %v448_v20 }
 0x37a   :  { %666 = vmatprep.subr.bf16.mxu1 %v728_v62 }
 0x37c   :  { %663 = vmatmul.mubr.msk.bf16.vlgmr.msra.gmra.mxu1 %vm224_vm1, %v453_v21 }
 0x37d   :  { %667 = vmatpush3.bf16.msra.mxu1 %v703_v22  ;;  %670 = vmatprep.mubr.msk.bf16.mxu1 %vm729_vm4, %v728_v62 }
 0x37e   :  { %668 = vmatprep.subr.bf16.mxu1 %v728_v62 }
 0x381   :  { %669 = vmatpush3.bf16.msra.mxu1 %v704_v23 }
 0x43c   :  { %v494_v24 = vpop.f32.mrf.mxu1 }
 0x43d   :  { %v500_v25 = vpack.c.bf16 %v494_v24, %v494_v24 }
 0x43e   :  { %v664_v26 = vpop.f32.mrf.mxu1 }
 0x43f   :  { %671 = vmatmul.mubr.msk.bf16.vlgmr.msra.gmra.mxu1 %vm372_vm3, %v500_v25 }
 0x440   :  { %v497_v27 = vpop.f32.mrf.mxu1 }
 0x442   :  { %v665_v28 = vpop.f32.mrf.mxu1 }
 0x4ff   :  { %v558_v30 = vpop.f32.mrf.mxu1 }
 0x500   :  { %v559_v31 = vadd.f32 %v612_v29, %v558_v30 }
 0x501   :  { %v672_v32 = vpop.f32.mrf.mxu1 }
 0x502   :  { %564 = vst [vmem:[#allocation2] sm:$0x3] %v559_v31 }
 0x503   :  { %v561_v33 = vpop.f32.mrf.mxu1 }
 0x504   :  { %716 = shalt.err (!%p713_p4)
}
 0x505   :  { %574 = dma.vmem_to_hbm [thread:$0]  %s572_s30, 32, %s885_s6, [#allocation3]   ;;  %v673_v34 = vpop.f32.mrf.mxu1 }
 0x506   :  { %725 = dma.done.wait [#allocation3], 32  }
 0x507   :  { %726 = vsyncadd [#allocation3], 4294967264 }
 0x508   :  { %578 = vsyncpa [#allocation3], 1 }

</bundles_post_ra>
